<compile_context>
chip_gen: v5e
topology: v5e:2x2
jax: 0.10.0
libtpu: 0.0.40
codegen_flags: <defaults>
</compile_context>

<pallas_src>
import functools

import jax
import jax.numpy as jnp
from jax.experimental import pallas as pl
from jax.experimental.pallas import tpu as pltpu


def _dwconv1d_kernel(*refs, K, pad, L, L_full, mult, has_bias):
    # x_ref: (ct, L)            one tile of input channels, unpadded length
    # w_ref: (mult, ct, K)      taps for this channel tile, all multipliers
    # b_ref: (ct, mult)         optional bias
    # o_ref: (ct, mult*L_full)  dense output block (stride-1 positions)
    if has_bias:
        x_ref, w_ref, b_ref, o_ref = refs
    else:
        x_ref, w_ref, o_ref = refs
        b_ref = None

    # Single load + single f32 upcast of the input tile; build the zero-padding
    # halo in registers (no wrapper jnp.pad, no per-tap ref reloads).
    xv = x_ref[...].astype(jnp.float32)                       # (ct, L)
    if pad > 0:
        z = jnp.zeros((xv.shape[0], pad), jnp.float32)
        xpad = jnp.concatenate([z, xv, z], axis=-1)           # (ct, L + 2*pad)
    else:
        xpad = xv

    w = w_ref[...].astype(jnp.float32)                        # (mult, ct, K), cast once

    outs = []
    for m in range(mult):                                     # static, unrolled
        wm = w[m]                                             # (ct, K)
        # First tap with '=' (no zero-fill pass), remaining taps accumulate in
        # vregs; each tap's operand is a static lane slice of the padded value.
        acc = xpad[:, 0:L_full] * wm[:, 0:1]
        for k in range(1, K):
            acc = acc + xpad[:, k:k + L_full] * wm[:, k:k + 1]
        if has_bias:
            acc = acc + b_ref[:, m:m + 1].astype(jnp.float32)
        outs.append(acc)

    res = outs[0] if mult == 1 else jnp.concatenate(outs, axis=-1)
    o_ref[...] = res.astype(o_ref.dtype)                      # single dense store


def _plan_tiling(C_in, L, L_full, mult, pad, itemsize, channel_tile):
    """Pick a channel tile that divides C_in, respects sublane packing, and fits
    a generation-aware per-step VMEM budget; also derive vmem_limit_bytes."""
    try:
        info = pltpu.get_tpu_info()
        vmem_cap = getattr(info, "vmem_capacity_bytes", None) or 64 * 1024 * 1024
    except Exception:
        vmem_cap = 64 * 1024 * 1024                      # conservative (v7x-sized)
    big_vmem = vmem_cap >= 100 * 1024 * 1024             # v5e / v6e: 128 MiB
    budget = (20 if big_vmem else 10) * 1024 * 1024      # per-step target

    def footprint(ct):
        # double-buffered x + out blocks, plus the f32 in-kernel working set.
        blocks = 2 * ct * L * itemsize + 2 * ct * mult * L_full * itemsize
        regs = 4 * ct * (L + 2 * pad + mult * L_full)
        return blocks + regs + 64 * 1024

    sub = {4: 8, 2: 16, 1: 32}.get(itemsize, 8)
    if channel_tile is not None:
        ct = channel_tile
    else:
        cap = max(1, budget // max(1, footprint(1)))
        if cap >= C_in:
            ct = C_in
        else:
            ct = None
            for cand in range(min(cap, C_in), 0, -1):
                if C_in % cand == 0 and cand % sub == 0:
                    ct = cand
                    break
            if ct is None:
                # Smallest legal aligned divisor, else the full dim (Mosaic wants
                # sublane multiples of `sub` or the whole C_in).
                ct = sub if C_in % sub == 0 else C_in
    assert C_in % ct == 0, "channel_tile must divide in_channels"

    hard_cap = int(vmem_cap * 0.75)                      # headroom for Mosaic scratch
    vmem_limit = min(hard_cap, max(32 * 1024 * 1024, 2 * footprint(ct)))
    return ct, vmem_limit


def depthwise_conv1d(x, weight, bias=None, *, stride=1, padding=0, channel_tile=None):
    """Depthwise nn.Conv1d forward.  x: (N, C_in, L), weight: (C_out, 1, K),
    optional bias: (C_out,).  groups == C_in, dilation == 1."""
    N, C_in, L = x.shape
    C_out, w_in, K = weight.shape
    assert w_in == 1, "depthwise weight must be (C_out, 1, K)"
    assert C_out % C_in == 0, "out_channels must be divisible by in_channels"
    assert stride >= 1 and padding >= 0
    mult = C_out // C_in
    L_full = L + 2 * padding - K + 1                 # stride-1 output length (kernel)
    L_out = (L + 2 * padding - K) // stride + 1      # requested output length
    assert L_out >= 1, "empty output length"

    ct, vmem_limit = _plan_tiling(C_in, L, L_full, mult, padding,
                                  x.dtype.itemsize, channel_tile)

    # (C_out,1,K) -> (C_in,mult,K) -> (mult,C_in,K): tiny one-time transpose so the
    # kernel indexes the multiplier on a leading dim.
    w3 = jnp.transpose(weight.reshape(C_in, mult, K), (1, 0, 2))
    has_bias = bias is not None

    kernel = functools.partial(
        _dwconv1d_kernel, K=K, pad=padding, L=L, L_full=L_full,
        mult=mult, has_bias=has_bias)

    in_specs = [
        pl.BlockSpec((None, ct, L), lambda n, c: (n, c, 0)),     # x tile
        pl.BlockSpec((mult, ct, K), lambda n, c: (0, c, 0)),     # taps
    ]
    args = [x, w3]
    if has_bias:
        in_specs.append(pl.BlockSpec((ct, mult), lambda n, c: (c, 0)))
        args.append(bias.reshape(C_in, mult))

    out = pl.pallas_call(
        kernel,
        out_shape=jax.ShapeDtypeStruct((N, C_in, mult * L_full), x.dtype),
        grid_spec=pltpu.PrefetchScalarGridSpec(
            num_scalar_prefetch=0,
            grid=(N, C_in // ct),
            in_specs=in_specs,
            out_specs=pl.BlockSpec((None, ct, mult * L_full), lambda n, c: (n, c, 0)),
        ),
        compiler_params=pltpu.CompilerParams(
            dimension_semantics=("parallel", "parallel"),
            vmem_limit_bytes=vmem_limit,
        ),
    )(*args)

    # (N, C_in, mult*L_full) -> (N, C_out, L_full): merge of adjacent dims, free.
    out = out.reshape(N, C_out, L_full)
    if stride > 1:
        out = out[:, :, ::stride]        # exact: stride-s conv == stride-1 conv sampled
    return out


def _reference(x, weight, bias, *, stride, padding):
    C_in = x.shape[1]
    out = jax.lax.conv_general_dilated(
        x, weight,
        window_strides=(stride,),
        padding=[(padding, padding)],
        dimension_numbers=("NCH", "OIH", "NCH"),
        feature_group_count=C_in,
    )
    if bias is not None:
        out = out + bias[None, :, None]
    return out


if __name__ == "__main__":
    # Module config: DepthwiseConv1d(4, 8, kernel_size=3, stride=1, padding=1, bias=False)
    in_channels, out_channels, kernel_size = 4, 8, 3
    stride, padding = 1, 1
    N, L = 2, 16

    key = jax.random.PRNGKey(0)
    kx, kw = jax.random.split(key)
    x = jax.random.normal(kx, (N, in_channels, L), dtype=jnp.float32)
    # nn.Conv1d weight shape: (out_channels, in_channels // groups, K) = (C_out, 1, K)
    weight = jax.random.normal(kw, (out_channels, 1, kernel_size), dtype=jnp.float32) * 0.1

    out = depthwise_conv1d(x, weight, stride=stride, padding=padding)
    out = jax.block_until_ready(out)

    ref = _reference(x, weight, None, stride=stride, padding=padding)
    assert out.shape == ref.shape, (out.shape, ref.shape)
    assert jnp.allclose(out, ref, atol=1e-5, rtol=1e-5), "mismatch vs reference conv"

    print("KERNEL_OK")
</pallas_src>

<mosaic_0001>
module attributes {stable_mosaic.version = 11 : i64} {
  func.func @_dwconv1d_kernel(%arg0: i32, %arg1: i32, %arg2: memref<1x4x16xf32, #tpu.memory_space<vmem>>, %arg3: memref<2x4x3xf32, #tpu.memory_space<vmem>>, %arg4: memref<1x4x32xf32, #tpu.memory_space<vmem>>) attributes {dimension_semantics = [#tpu.dimension_semantics<parallel>, #tpu.dimension_semantics<parallel>], iteration_bounds = array<i64: 2, 1>, scalar_prefetch = 0 : i64, scratch_operands = 0 : i64, tpu.core_type = #tpu.core_type<tc>, window_params = [{transform_indices = @transform_0, window_bounds = array<i64: 1, 4, 16>}, {transform_indices = @transform_1, window_bounds = array<i64: 2, 4, 3>}, {transform_indices = @transform_2, window_bounds = array<i64: 1, 4, 32>}]} {
    %c0 = arith.constant 0 : index
    %c0_0 = arith.constant 0 : index
    %c0_1 = arith.constant 0 : index
    %0 = vector.load %arg2[%c0, %c0_0, %c0_1] : memref<1x4x16xf32, #tpu.memory_space<vmem>>, vector<1x4x16xf32>
    %1 = vector.shape_cast %0 : vector<1x4x16xf32> to vector<4x16xf32>
    %cst = arith.constant 0.000000e+00 : f32
    %2 = vector.broadcast %cst : f32 to vector<4x1xf32>
    %3 = tpu.concatenate %2, %1, %2 in 1 : vector<4x1xf32>, vector<4x16xf32>, vector<4x1xf32> -> vector<4x18xf32>
    %c0_2 = arith.constant 0 : index
    %c0_3 = arith.constant 0 : index
    %c0_4 = arith.constant 0 : index
    %4 = vector.load %arg3[%c0_2, %c0_3, %c0_4] : memref<2x4x3xf32, #tpu.memory_space<vmem>>, vector<2x4x3xf32>
    %5 = vector.extract_strided_slice %4 {offsets = [0, 0, 0], sizes = [1, 4, 3], strides = [1, 1, 1]} : vector<2x4x3xf32> to vector<1x4x3xf32>
    %6 = vector.shape_cast %5 : vector<1x4x3xf32> to vector<4x3xf32>
    %7 = vector.extract_strided_slice %3 {offsets = [0, 0], sizes = [4, 16], strides = [1, 1]} : vector<4x18xf32> to vector<4x16xf32>
    %8 = vector.extract_strided_slice %6 {offsets = [0, 0], sizes = [4, 1], strides = [1, 1]} : vector<4x3xf32> to vector<4x1xf32>
    %9 = vector.broadcast %8 : vector<4x1xf32> to vector<4x16xf32>
    %10 = arith.mulf %7, %9 : vector<4x16xf32>
    %11 = vector.extract_strided_slice %3 {offsets = [0, 1], sizes = [4, 16], strides = [1, 1]} : vector<4x18xf32> to vector<4x16xf32>
    %12 = vector.extract_strided_slice %6 {offsets = [0, 1], sizes = [4, 1], strides = [1, 1]} : vector<4x3xf32> to vector<4x1xf32>
    %13 = vector.broadcast %12 : vector<4x1xf32> to vector<4x16xf32>
    %14 = arith.mulf %11, %13 : vector<4x16xf32>
    %15 = arith.addf %10, %14 : vector<4x16xf32>
    %16 = vector.extract_strided_slice %3 {offsets = [0, 2], sizes = [4, 16], strides = [1, 1]} : vector<4x18xf32> to vector<4x16xf32>
    %17 = vector.extract_strided_slice %6 {offsets = [0, 2], sizes = [4, 1], strides = [1, 1]} : vector<4x3xf32> to vector<4x1xf32>
    %18 = vector.broadcast %17 : vector<4x1xf32> to vector<4x16xf32>
    %19 = arith.mulf %16, %18 : vector<4x16xf32>
    %20 = arith.addf %15, %19 : vector<4x16xf32>
    %21 = vector.extract_strided_slice %4 {offsets = [1, 0, 0], sizes = [1, 4, 3], strides = [1, 1, 1]} : vector<2x4x3xf32> to vector<1x4x3xf32>
    %22 = vector.shape_cast %21 : vector<1x4x3xf32> to vector<4x3xf32>
    %23 = vector.extract_strided_slice %3 {offsets = [0, 0], sizes = [4, 16], strides = [1, 1]} : vector<4x18xf32> to vector<4x16xf32>
    %24 = vector.extract_strided_slice %22 {offsets = [0, 0], sizes = [4, 1], strides = [1, 1]} : vector<4x3xf32> to vector<4x1xf32>
    %25 = vector.broadcast %24 : vector<4x1xf32> to vector<4x16xf32>
    %26 = arith.mulf %23, %25 : vector<4x16xf32>
    %27 = vector.extract_strided_slice %3 {offsets = [0, 1], sizes = [4, 16], strides = [1, 1]} : vector<4x18xf32> to vector<4x16xf32>
    %28 = vector.extract_strided_slice %22 {offsets = [0, 1], sizes = [4, 1], strides = [1, 1]} : vector<4x3xf32> to vector<4x1xf32>
    %29 = vector.broadcast %28 : vector<4x1xf32> to vector<4x16xf32>
    %30 = arith.mulf %27, %29 : vector<4x16xf32>
    %31 = arith.addf %26, %30 : vector<4x16xf32>
    %32 = vector.extract_strided_slice %3 {offsets = [0, 2], sizes = [4, 16], strides = [1, 1]} : vector<4x18xf32> to vector<4x16xf32>
    %33 = vector.extract_strided_slice %22 {offsets = [0, 2], sizes = [4, 1], strides = [1, 1]} : vector<4x3xf32> to vector<4x1xf32>
    %34 = vector.broadcast %33 : vector<4x1xf32> to vector<4x16xf32>
    %35 = arith.mulf %32, %34 : vector<4x16xf32>
    %36 = arith.addf %31, %35 : vector<4x16xf32>
    %37 = tpu.concatenate %20, %36 in 1 : vector<4x16xf32>, vector<4x16xf32> -> vector<4x32xf32>
    %c0_5 = arith.constant 0 : index
    %c0_6 = arith.constant 0 : index
    %c0_7 = arith.constant 0 : index
    %38 = vector.load %arg4[%c0_5, %c0_6, %c0_7] : memref<1x4x32xf32, #tpu.memory_space<vmem>>, vector<1x4x32xf32>
    %39 = vector.shape_cast %38 : vector<1x4x32xf32> to vector<4x32xf32>
    %40 = vector.shape_cast %37 : vector<4x32xf32> to vector<1x4x32xf32>
    tpu.vector_store %arg4[%c0_5, %c0_6, %c0_7], %40 {strides = array<i32>} : memref<1x4x32xf32, #tpu.memory_space<vmem>>, vector<1x4x32xf32>,
    return
  }
  func.func @transform_0(%arg0: i32, %arg1: i32) -> (i32, i32, i32) {
    %c0_i32 = arith.constant 0 : i32
    %c0_i32_0 = arith.constant 0 : i32
    return %arg0, %arg1, %c0_i32 : i32, i32, i32
  }
  func.func @transform_1(%arg0: i32, %arg1: i32) -> (i32, i32, i32) {
    %c0_i32 = arith.constant 0 : i32
    %c0_i32_0 = arith.constant 0 : i32
    %c0_i32_1 = arith.constant 0 : i32
    return %c0_i32, %arg1, %c0_i32_0 : i32, i32, i32
  }
  func.func @transform_2(%arg0: i32, %arg1: i32) -> (i32, i32, i32) {
    %c0_i32 = arith.constant 0 : i32
    %c0_i32_0 = arith.constant 0 : i32
    return %arg0, %arg1, %c0_i32 : i32, i32, i32
  }
}

</mosaic_0001>

<bundles_post_ra>
// kernel: tpu_custom_call.1
= control target key start
LH: loop header
LB: loop body
LE: loop exit
PB: predicated region body
PF: predicated region fallthrough
CT: control target
= control target key end

     0   :  { %7 = vsyncpa [#allocation3], 0  ;;  %s641_s0 = inlined_call_operand.vmem [shape: f32[2,4,16], index: 0, kind: input, shape index: {}]   ;;  %s642_s1 = inlined_call_operand.vmem [shape: f32[2,4,3], index: 1, kind: input, shape index: {}]   ;;  %s643_s2 = inlined_call_operand.hbm [shape: f32[2,4,32], index: 2, kind: output, shape index: {}]  }
   0x1   :  { %9 = vsyncpa [#allocation3 + $0x1], 0  ;;  %s538_s9 = smov 0   ;;  %s540_s10 = smov 0  }
   0x2   :  { %s542_s11 = smov 0   ;;  %s544_s12 = smov 0  }
   0x3   :  { %s546_s13 = smov 0   ;;  %s548_s14 = smov 0  }
   0x4 LB: > { %s355_s15 = sadd.s32 4294967295, %s514_s14   ;;  %s356_s16 = sadd.s32 4294967294, %s514_s14   ;;  %s514_s14 = sphi %s548_s14, %s15_s14   ;;  %s510_s13 = sphi %s546_s13, %s650_s13   ;;  %s506_s12 = sphi %s544_s12, %s649_s12   ;;  %s502_s11 = sphi %s542_s11, %s648_s11   ;;  %s498_s10 = sphi %s540_s10, %s647_s10   ;;  %s494_s9 = sphi %s538_s9, %s646_s9  }
   0x5   : > { %s27_s17 = sadd.s32 1, %s510_s13  ;;  %s90_s18 = sadd.s32 1, %s502_s11 }
   0x6   : > { %p29_p0 = scmp.ge.s32.totalorder %s27_s17, 2  ;;  %p100_p1 = scmp.ne.s32.totalorder %s502_s11, %s498_s10 }
   0x7   : > { %p101_p2 = scmp.eq.s32.totalorder %s355_s15, 1  ;;  %p106_p3 = scmp.ne.s32.totalorder %s498_s10, %s494_s9 }
   0x8   : > { %s652_s17 = smov (%p29_p0, %s27_s17), 0  ;;  %p107_p5 = scmp.eq.s32.totalorder %s356_s16, 1 }
   0x9   : > { %p578_p4 = por %p101_p2, %p100_p1  ;;  %s85_s20 = ssub.s32 %s510_s13, %s652_s17 }
   0xa   : > { %p360_p6 = scmp.ge.s32.totalorder %s514_s14, 1  ;;  %p88_p7 = scmp.eq.s32.totalorder %s85_s20, 0 }
   0xb   : > { %p585_p8 = por %p107_p5, %p106_p3  ;;  %p142_p9 = scmp.lt.s32.totalorder %s514_s14, 3 }
   0xc   : > { %s591_s22 = scalar_select %p88_p7, %s502_s11, %s90_s18  }
   0xd   : > { %p143_p10 = pnand %p360_p6, %p142_p9 }
   0xe   : > { %p170_p11 = scmp.lt.s32.totalorder (!%p143_p10), %s506_s12, 1  ;;  %s519_s30 = smov (!%p143_p10), 1  }
   0xf   : > { %146 = sbr.rel (%p143_p10) target bundleno = 388 (0x184), region = 28  ;;  %s520_s5 = smov (!%p143_p10), 126  }
  0x10   : > { %s521_s6 = smov (!%p143_p10), 127   ;;  %s522_s7 = smov (!%p143_p10), 16  }
  0x11   : > { %s167_s8 = sand.u32 (!%p143_p10), 1, %s498_s10   ;;  %s364_s16 = sshll.u32 (!%p143_p10), %s506_s12, 2 }
  0x12   : > { %s361_s15 = sshll.u32 (!%p143_p10), %s167_s8, 2  ;;  %s264_s23 = scalar_lea.hbm (!%p143_p10), %s643_s2, %s364_s16 }
  0x13   : > { %s169_s24 = scalar_lea.vmem (!%p143_p10), [#allocation2], %s361_s15  ;;  %s456_s3 = scalar_lea.hbm (!%p143_p10), %s643_s2, 8 }
  0x14   : > { %v191_v0 = vld [vmem:[%s642_s1 + $0x4] sm:$0xf]  ;;  %v516_v1 = vmov 2   ;;  %v517_v2 = vmov 1   ;;  %s171_s25 = scalar_select %p170_p11, %s506_s12, 1  ;;  %v518_v3 = vmov 0  }
  0x15   : > { %430 = vset.pattern.permute.xlu1 %v516_v1  ;;  %429 = vset.pattern.permute.xlu0 %v517_v2  ;;  %v190_v5 = vld [vmem:[%s642_s1] sm:$0xf]  ;;  %vm186_vm0 = vcmask 7168   ;;  %vm188_vm1 = vcmask 138240   ;;  %vm248_vm2 = vcmask 130048   ;;  %vm250_vm3 = vcmask 257024  }
  0x16   : > { %235 = vperm.xlu1 %430, %v191_v0   ;;  %432 = vset.pattern.permute.xlu2 %v518_v3  ;;  %s362_s26 = sshll.u32 %s171_s25, 2  ;;  %s266_s25 = sshll.u32 %s169_s24, 4  ;;  %s267_s25 = int_to_ptr.vmem [resolvable:$true] %s266_s25 }
  0x17   : > { %220 = vperm.xlu2 %432, %v191_v0   ;;  %s176_s29 = scalar_lea.vmem %s641_s0, %s362_s26  ;;  %s268_s26 = sshll.u32 %s264_s23, 4  ;;  %s269_s26 = int_to_ptr.hbm [resolvable:$true] %s268_s26 }
  0x18   : > { %v181_v4 = vld [vmem:[%s176_s29] sm:$0xf]  ;;  %s253_s12 = scalar_lea.sflag [#allocation3], %s167_s8  ;;  %s450_s27 = sshra.s32 %s269_s26, 4  ;;  %s451_s27 = int_to_ptr.hbm [resolvable:$true] %s450_s27 }
  0x19   : > { %183 = vrot.lane.b32.xlu0 %v181_v4, %s519_s30  ;;  %s452_s28 = scalar_lea.hbm %s451_s27, 4  ;;  %p457_p1 = scmp.lt.s32.totalorder %s451_s27, %s643_s2 }
  0x1a   : > { %p453_p12 = scmp.ne.s32.totalorder %s451_s27, %s452_s28  ;;  %p458_p2 = scmp.lt.s32.totalorder %s456_s3, %s452_s28 }
  0x1c   : > { %p454_p13 = pnand %p453_p12, %p578_p4  ;;  %p459_p3 = por %p458_p2, %p457_p1 }
  0x1e   : > { %431 = vset.pattern.permute.xlu1 %v517_v2  ;;  %p455_p0 = pneg %p454_p13 }
  0x1f   : > { %199 = vperm.xlu1 %431, %v190_v5   ;;  %433 = vset.pattern.permute.xlu2 %v516_v1 }
  0x20   : > { %209 = vperm.xlu2 %433, %v190_v5   ;;  %p460_p5 = pnand %p459_p3, %p455_p0 }
  0x21   : > { %225 = vperm.xlu0 %429, %v191_v0  }
  0x29   : > { %434 = vset.pattern.permute.xlu0 %v518_v3 }
  0x2a   : > { %194 = vperm.xlu0 %434, %v190_v5  }
  0x32   : > { %435 = vset.pattern.permute.xlu0 %v516_v1 }
  0x71   : > { %v221_v6 = vpop.permute.xlu2 %220 }
  0x7a   : > { %v210_v13 = vpop.permute.xlu2 %209 }
  0x88   : > { %v236_v9 = vpop.permute.xlu1 %235 }
  0x8b   : > { %v184_v7 = vpop.permute.xlu0 %183 }
  0x8c   : > { %v187_v8 = vsel %vm186_vm0, 0.0, %v184_v7 }
  0x8d   : > { %v189_v10 = vsel %vm188_vm1, %v187_v8, 0.0 }
  0x8e   : > { %v238_v11 = vmul.f32 %v236_v9, %v189_v10  ;;  %v223_v12 = vmul.f32 %v221_v6, %v189_v10  ;;  %v212_v16 = vmul.f32 %v210_v13, %v189_v10 }
  0x90   : > { %240 = vrot.lane.b32.xlu2 %v238_v11, %s520_s5 }
  0x91   : > { %v200_v17 = vpop.permute.xlu1 %199 }
  0x92   : > { %v202_v18 = vmul.f32 %v200_v17, %v189_v10 }
  0x93   : > { %v226_v14 = vpop.permute.xlu0 %225 }
  0x94   : > { %v228_v15 = vmul.f32 %v226_v14, %v189_v10 }
  0x96   : > { %230 = vrot.lane.b32.xlu1 %v228_v15, %s521_s6 }
  0x98   : > { %214 = vrot.lane.b32.xlu2 %v212_v16, %s520_s5 }
  0x9c   : > { %v195_v23 = vpop.permute.xlu0 %194 }
  0x9d   : > { %v197_v25 = vmul.f32 %v195_v23, %v189_v10 }
  0x9e   : > { %204 = vrot.lane.b32.xlu1 %v202_v18, %s521_s6 }
  0xea   : > { %v241_v21 = vpop.permute.xlu2 %240 }
  0xf2   : > { %v215_v27 = vpop.permute.xlu2 %214 }
 0x108   : > { %v231_v19 = vpop.permute.xlu1 %230 }
 0x109   : > { %v233_v20 = vadd.f32 %v231_v19, %v223_v12 }
 0x10b   : > { %v243_v22 = vadd.f32 %v241_v21, %v233_v20 }
 0x10d   : > { %245 = vrot.lane.b32.xlu1 %v243_v22, %s522_s7 }
 0x110   : > { %v205_v24 = vpop.permute.xlu1 %204 }
 0x111   : > { %v207_v26 = vadd.f32 %v205_v24, %v197_v25 }
 0x113   : > { %v217_v28 = vadd.f32 %v215_v27, %v207_v26 }
 0x17f   : > { %v246_v29 = vpop.permute.xlu1 %245 }
 0x180   : > { %v249_v30 = vsel %vm248_vm2, %v217_v28, %v246_v29 }
 0x181   : > { %251 = vst.msk [vmem:[%s169_s24] sm:$0xf] %vm250_vm3, %v249_v30 }
 0x182   : > { %463 = shalt.err (!%p460_p5)
}
 0x183   : > { %367 = dma.vmem_to_hbm [thread:$0]  (%p578_p4), %s267_s25, 64, %s269_s26, %s253_s12  }
 0x184 PF: > { %p373_p6 = scmp.ge.s32.totalorder %s514_s14, 2  ;;  %s280_s6 = sand.u32 1, %s494_s9  }
 0x185   : > { %s281_s7 = scalar_lea.sflag [#allocation3], %s280_s6 }
 0x186   : > { %p370_p7 = pnand %p373_p6, %p585_p8 }
 0x188   : > { %p371_p9 = pneg %p370_p7 }
 0x18a   : > { %489 = dma.done.wait (%p371_p9), %s281_s7, 64  }
 0x18b   : > { %491 = vsyncadd (%p371_p9), %s281_s7, 4294967232  ;;  %s15_s14 = sadd.s32 1, %s514_s14   ;;  %s646_s9 = smov %s498_s10 }
 0x18c   : > { %p12_p10 = scmp.ge.s32.totalorder %s15_s14, 4   ;;  %s647_s10 = smov %s502_s11 }
 0x18d   : > { %s648_s11 = smov %s591_s22  ;;  %s649_s12 = smov %s510_s13 }
 0x18e   : > { %s650_s13 = smov %s652_s17  ;;  %14 = sbr.rel (!%p12_p10) target bundleno = 4 (0x4), region = 66 }
 0x193   :  { %287 = vsyncpa [#allocation3], 1 }
 0x194   :  { %289 = vsyncpa [#allocation3 + $0x1], 1 }

</bundles_post_ra>
